<compile_context>
chip_gen: v7x
topology: tpu7x:2x2x1
jax: 0.10.0
libtpu: 0.0.40
codegen_flags: <defaults>
</compile_context>

<pallas_src>
import jax
import jax.numpy as jnp
from jax.experimental import pallas as pl
from jax.experimental.pallas import tpu as pltpu


# ----------------------------------------------------------------------------
# Fused Pallas kernel: whole SparseRepresentation forward for one row tile
# ----------------------------------------------------------------------------
def _sparse_repr_kernel(
    x_ref, eps_ref,
    enc_w, enc_b, enc_s, enc_t,        # encoder: Linear + folded BN (+ReLU)
    m_w, m_b, m_s, m_t,                # e_mean:  Linear + folded BN
    v_w, v_b, v_s, v_t,                # e_log_var: Linear + folded BN
    d1_w, d1_b, d1_s, d1_t,            # decoder layer 1: Linear + BN (+ReLU)
    dl_w, dl_b, dl_s, dl_t,            # decoder last:    Linear + BN (+Sigmoid)
    n1_w, n1_b, n1_s, n1_t,            # NN layer 1: Linear + BN (+ReLU)
    n2_w, n2_b, n2_s, n2_t,            # NN layer 2: Linear + BN (+ReLU)
    n3_w, n3_b,                        # NN layer 3: Linear (+Softmax)
    mean_ref, logvar_ref, recon_ref, ypred_ref,
):
    def lin_bn(h, w, b, s, t, relu):
        # y = ((h @ W) + b) * scale + shift   (scale/shift fold eval-mode BatchNorm)
        y = jnp.dot(h, w[...], preferred_element_type=jnp.float32)
        y = (y + b[...]) * s[...] + t[...]
        return jnp.maximum(y, 0.0) if relu else y

    x = x_ref[...]

    # ---- VAE encoder (Dropout is identity in eval mode) ----
    h = lin_bn(x, enc_w, enc_b, enc_s, enc_t, relu=True)
    mean = lin_bn(h, m_w, m_b, m_s, m_t, relu=False)
    log_var = lin_bn(h, v_w, v_b, v_s, v_t, relu=False)
    mean_ref[...] = mean
    logvar_ref[...] = log_var

    # ---- reparameterization: z = mean + eps * exp(0.5 * log_var) ----
    z = mean + eps_ref[...] * jnp.exp(0.5 * log_var)

    # ---- VAE decoder ----
    d = lin_bn(z, d1_w, d1_b, d1_s, d1_t, relu=True)
    r = lin_bn(d, dl_w, dl_b, dl_s, dl_t, relu=False)
    recon_ref[...] = 1.0 / (1.0 + jnp.exp(-r))          # Sigmoid

    # ---- NN classifier on `mean` ----
    g = lin_bn(mean, n1_w, n1_b, n1_s, n1_t, relu=True)
    g = lin_bn(g, n2_w, n2_b, n2_s, n2_t, relu=True)
    y = jnp.dot(g, n3_w[...], preferred_element_type=jnp.float32) + n3_b[...]
    mx = jnp.max(y, axis=1, keepdims=True)
    e = jnp.exp(y - mx)
    ypred_ref[...] = e / jnp.sum(e, axis=1, keepdims=True)


def sparse_representation_infer(x, eps, flat_params, *, row_tile=None):
    """Run the fused forward. Returns (mean, log_var, recon_x, y_pred)."""
    n, d_in = x.shape
    d_lat = eps.shape[1]
    n_out = flat_params[-2].shape[1]          # n3_w: (n2, n_classes)

    tn = n if row_tile is None else min(row_tile, n)
    grid = (pl.cdiv(n, tn),)

    def rows(cols):
        # row-tiled block; column dim is the full feature width (lane-dense as possible)
        return pl.BlockSpec((tn, cols), lambda i: (i, 0))

    def whole(arr):
        # broadcast parameter block to every row tile
        return pl.BlockSpec(arr.shape, lambda i: (0,) * arr.ndim)

    in_specs = [rows(d_in), rows(d_lat)] + [whole(p) for p in flat_params]
    out_shape = (
        jax.ShapeDtypeStruct((n, d_lat), jnp.float32),   # mean
        jax.ShapeDtypeStruct((n, d_lat), jnp.float32),   # log_var
        jax.ShapeDtypeStruct((n, d_in), jnp.float32),    # recon_x
        jax.ShapeDtypeStruct((n, n_out), jnp.float32),   # y_pred
    )
    out_specs = (rows(d_lat), rows(d_lat), rows(d_in), rows(n_out))

    return pl.pallas_call(
        _sparse_repr_kernel,
        grid=grid,
        in_specs=in_specs,
        out_specs=out_specs,
        out_shape=out_shape,
        compiler_params=pltpu.CompilerParams(dimension_semantics=("parallel",)),
    )(x, eps, *flat_params)


# ----------------------------------------------------------------------------
# Deterministic parameter construction (eval-mode BN folded into scale/shift)
# ----------------------------------------------------------------------------
def make_linear(key, din, dout):
    kw, kb = jax.random.split(key)
    bound = 1.0 / jnp.sqrt(jnp.float32(din))
    w = jax.random.uniform(kw, (din, dout), jnp.float32, -bound, bound)
    b = jax.random.uniform(kb, (1, dout), jnp.float32, -bound, bound)
    return w, b


def make_bn(key, d, eps=1e-5):
    k1, k2, k3, k4 = jax.random.split(key, 4)
    gamma = 1.0 + 0.1 * jax.random.uniform(k1, (1, d), jnp.float32, -1.0, 1.0)
    beta = 0.1 * jax.random.uniform(k2, (1, d), jnp.float32, -1.0, 1.0)
    run_mean = 0.1 * jax.random.uniform(k3, (1, d), jnp.float32, -1.0, 1.0)
    run_var = jax.random.uniform(k4, (1, d), jnp.float32, 0.5, 1.5)
    scale = gamma / jnp.sqrt(run_var + eps)
    shift = beta - run_mean * scale
    return scale, shift


def make_params(key, vae_dims, nn_dims):
    d0, d1, d2 = vae_dims
    ks = jax.random.split(key, 16)
    enc_w, enc_b = make_linear(ks[0], d0, d1); enc_s, enc_t = make_bn(ks[1], d1)
    m_w, m_b = make_linear(ks[2], d1, d2);     m_s, m_t = make_bn(ks[3], d2)
    v_w, v_b = make_linear(ks[4], d1, d2);     v_s, v_t = make_bn(ks[5], d2)
    d1_w, d1_b = make_linear(ks[6], d2, d1);   d1_s, d1_t = make_bn(ks[7], d1)
    dl_w, dl_b = make_linear(ks[8], d1, d0);   dl_s, dl_t = make_bn(ks[9], d0)
    n1_w, n1_b = make_linear(ks[10], nn_dims[0], nn_dims[1]); n1_s, n1_t = make_bn(ks[11], nn_dims[1])
    n2_w, n2_b = make_linear(ks[12], nn_dims[1], nn_dims[2]); n2_s, n2_t = make_bn(ks[13], nn_dims[2])
    n3_w, n3_b = make_linear(ks[14], nn_dims[2], nn_dims[3])
    return (enc_w, enc_b, enc_s, enc_t,
            m_w, m_b, m_s, m_t,
            v_w, v_b, v_s, v_t,
            d1_w, d1_b, d1_s, d1_t,
            dl_w, dl_b, dl_s, dl_t,
            n1_w, n1_b, n1_s, n1_t,
            n2_w, n2_b, n2_s, n2_t,
            n3_w, n3_b)


# ----------------------------------------------------------------------------
# Pure-JAX reference (same math) for a correctness check
# ----------------------------------------------------------------------------
def reference_forward(x, eps, p):
    (enc_w, enc_b, enc_s, enc_t, m_w, m_b, m_s, m_t, v_w, v_b, v_s, v_t,
     d1_w, d1_b, d1_s, d1_t, dl_w, dl_b, dl_s, dl_t,
     n1_w, n1_b, n1_s, n1_t, n2_w, n2_b, n2_s, n2_t, n3_w, n3_b) = p

    def lin_bn(h, w, b, s, t, relu):
        y = (jnp.dot(h, w) + b) * s + t
        return jnp.maximum(y, 0.0) if relu else y

    h = lin_bn(x, enc_w, enc_b, enc_s, enc_t, True)
    mean = lin_bn(h, m_w, m_b, m_s, m_t, False)
    log_var = lin_bn(h, v_w, v_b, v_s, v_t, False)
    z = mean + eps * jnp.exp(0.5 * log_var)
    d = lin_bn(z, d1_w, d1_b, d1_s, d1_t, True)
    recon = jax.nn.sigmoid(lin_bn(d, dl_w, dl_b, dl_s, dl_t, False))
    g = lin_bn(mean, n1_w, n1_b, n1_s, n1_t, True)
    g = lin_bn(g, n2_w, n2_b, n2_s, n2_t, True)
    y = jnp.dot(g, n3_w) + n3_b
    y_pred = jax.nn.softmax(y, axis=1)
    return mean, log_var, recon, y_pred


# ----------------------------------------------------------------------------
if __name__ == "__main__":
    key = jax.random.PRNGKey(0)

    VAE_DIMS = [32, 24, 8]        # [d_in, d_hidden, d_latent]
    NN_DIMS = [8, 16, 16, 4]      # NN input = latent (mean) dim
    N = 8                         # batch rows

    k_params, k_x, k_eps = jax.random.split(key, 3)
    flat_params = make_params(k_params, VAE_DIMS, NN_DIMS)
    x = jax.random.normal(k_x, (N, VAE_DIMS[0]), jnp.float32)
    eps = jax.random.normal(k_eps, (N, VAE_DIMS[-1]), jnp.float32)

    mean, log_var, recon_x, y_pred = sparse_representation_infer(x, eps, flat_params)
    (mean, log_var, recon_x, y_pred) = jax.block_until_ready((mean, log_var, recon_x, y_pred))

    # shape / sanity checks
    assert mean.shape == (N, VAE_DIMS[-1])
    assert log_var.shape == (N, VAE_DIMS[-1])
    assert recon_x.shape == (N, VAE_DIMS[0])
    assert y_pred.shape == (N, NN_DIMS[-1])
    for a in (mean, log_var, recon_x, y_pred):
        assert bool(jnp.all(jnp.isfinite(a)))
    assert bool(jnp.all((recon_x >= 0.0) & (recon_x <= 1.0)))
    assert bool(jnp.allclose(jnp.sum(y_pred, axis=1), 1.0, atol=1e-5))

    # numerical check vs pure-JAX reference (loose tol: MXU vs XLA dot algorithms differ)
    r_mean, r_logvar, r_recon, r_ypred = reference_forward(x, eps, flat_params)
    assert bool(jnp.allclose(mean, r_mean, atol=1e-2, rtol=1e-2))
    assert bool(jnp.allclose(log_var, r_logvar, atol=1e-2, rtol=1e-2))
    assert bool(jnp.allclose(recon_x, r_recon, atol=1e-2, rtol=1e-2))
    assert bool(jnp.allclose(y_pred, r_ypred, atol=1e-2, rtol=1e-2))

    print("KERNEL_OK")
</pallas_src>

<mosaic_0001>
module attributes {stable_mosaic.version = 11 : i64} {
  func.func @_sparse_repr_kernel(%arg0: i32, %arg1: memref<8x32xf32, #tpu.memory_space<vmem>>, %arg2: memref<8x8xf32, #tpu.memory_space<vmem>>, %arg3: memref<32x24xf32, #tpu.memory_space<vmem>>, %arg4: memref<1x24xf32, #tpu.memory_space<vmem>>, %arg5: memref<1x24xf32, #tpu.memory_space<vmem>>, %arg6: memref<1x24xf32, #tpu.memory_space<vmem>>, %arg7: memref<24x8xf32, #tpu.memory_space<vmem>>, %arg8: memref<1x8xf32, #tpu.memory_space<vmem>>, %arg9: memref<1x8xf32, #tpu.memory_space<vmem>>, %arg10: memref<1x8xf32, #tpu.memory_space<vmem>>, %arg11: memref<24x8xf32, #tpu.memory_space<vmem>>, %arg12: memref<1x8xf32, #tpu.memory_space<vmem>>, %arg13: memref<1x8xf32, #tpu.memory_space<vmem>>, %arg14: memref<1x8xf32, #tpu.memory_space<vmem>>, %arg15: memref<8x24xf32, #tpu.memory_space<vmem>>, %arg16: memref<1x24xf32, #tpu.memory_space<vmem>>, %arg17: memref<1x24xf32, #tpu.memory_space<vmem>>, %arg18: memref<1x24xf32, #tpu.memory_space<vmem>>, %arg19: memref<24x32xf32, #tpu.memory_space<vmem>>, %arg20: memref<1x32xf32, #tpu.memory_space<vmem>>, %arg21: memref<1x32xf32, #tpu.memory_space<vmem>>, %arg22: memref<1x32xf32, #tpu.memory_space<vmem>>, %arg23: memref<8x16xf32, #tpu.memory_space<vmem>>, %arg24: memref<1x16xf32, #tpu.memory_space<vmem>>, %arg25: memref<1x16xf32, #tpu.memory_space<vmem>>, %arg26: memref<1x16xf32, #tpu.memory_space<vmem>>, %arg27: memref<16x16xf32, #tpu.memory_space<vmem>>, %arg28: memref<1x16xf32, #tpu.memory_space<vmem>>, %arg29: memref<1x16xf32, #tpu.memory_space<vmem>>, %arg30: memref<1x16xf32, #tpu.memory_space<vmem>>, %arg31: memref<16x4xf32, #tpu.memory_space<vmem>>, %arg32: memref<1x4xf32, #tpu.memory_space<vmem>>, %arg33: memref<8x8xf32, #tpu.memory_space<vmem>>, %arg34: memref<8x8xf32, #tpu.memory_space<vmem>>, %arg35: memref<8x32xf32, #tpu.memory_space<vmem>>, %arg36: memref<8x4xf32, #tpu.memory_space<vmem>>) attributes {dimension_semantics = [#tpu.dimension_semantics<parallel>], iteration_bounds = array<i64: 1>, scalar_prefetch = 0 : i64, scratch_operands = 0 : i64, tpu.core_type = #tpu.core_type<tc>, window_params = [{transform_indices = @transform_0, window_bounds = array<i64: 8, 32>}, {transform_indices = @transform_1, window_bounds = array<i64: 8, 8>}, {pipeline_mode = #tpu.pipeline_mode<synchronous>, transform_indices = @transform_2, window_bounds = array<i64: 32, 24>}, {pipeline_mode = #tpu.pipeline_mode<synchronous>, transform_indices = @transform_3, window_bounds = array<i64: 1, 24>}, {pipeline_mode = #tpu.pipeline_mode<synchronous>, transform_indices = @transform_4, window_bounds = array<i64: 1, 24>}, {pipeline_mode = #tpu.pipeline_mode<synchronous>, transform_indices = @transform_5, window_bounds = array<i64: 1, 24>}, {pipeline_mode = #tpu.pipeline_mode<synchronous>, transform_indices = @transform_6, window_bounds = array<i64: 24, 8>}, {pipeline_mode = #tpu.pipeline_mode<synchronous>, transform_indices = @transform_7, window_bounds = array<i64: 1, 8>}, {pipeline_mode = #tpu.pipeline_mode<synchronous>, transform_indices = @transform_8, window_bounds = array<i64: 1, 8>}, {pipeline_mode = #tpu.pipeline_mode<synchronous>, transform_indices = @transform_9, window_bounds = array<i64: 1, 8>}, {pipeline_mode = #tpu.pipeline_mode<synchronous>, transform_indices = @transform_10, window_bounds = array<i64: 24, 8>}, {pipeline_mode = #tpu.pipeline_mode<synchronous>, transform_indices = @transform_11, window_bounds = array<i64: 1, 8>}, {pipeline_mode = #tpu.pipeline_mode<synchronous>, transform_indices = @transform_12, window_bounds = array<i64: 1, 8>}, {pipeline_mode = #tpu.pipeline_mode<synchronous>, transform_indices = @transform_13, window_bounds = array<i64: 1, 8>}, {pipeline_mode = #tpu.pipeline_mode<synchronous>, transform_indices = @transform_14, window_bounds = array<i64: 8, 24>}, {pipeline_mode = #tpu.pipeline_mode<synchronous>, transform_indices = @transform_15, window_bounds = array<i64: 1, 24>}, {pipeline_mode = #tpu.pipeline_mode<synchronous>, transform_indices = @transform_16, window_bounds = array<i64: 1, 24>}, {pipeline_mode = #tpu.pipeline_mode<synchronous>, transform_indices = @transform_17, window_bounds = array<i64: 1, 24>}, {pipeline_mode = #tpu.pipeline_mode<synchronous>, transform_indices = @transform_18, window_bounds = array<i64: 24, 32>}, {pipeline_mode = #tpu.pipeline_mode<synchronous>, transform_indices = @transform_19, window_bounds = array<i64: 1, 32>}, {pipeline_mode = #tpu.pipeline_mode<synchronous>, transform_indices = @transform_20, window_bounds = array<i64: 1, 32>}, {pipeline_mode = #tpu.pipeline_mode<synchronous>, transform_indices = @transform_21, window_bounds = array<i64: 1, 32>}, {pipeline_mode = #tpu.pipeline_mode<synchronous>, transform_indices = @transform_22, window_bounds = array<i64: 8, 16>}, {pipeline_mode = #tpu.pipeline_mode<synchronous>, transform_indices = @transform_23, window_bounds = array<i64: 1, 16>}, {pipeline_mode = #tpu.pipeline_mode<synchronous>, transform_indices = @transform_24, window_bounds = array<i64: 1, 16>}, {pipeline_mode = #tpu.pipeline_mode<synchronous>, transform_indices = @transform_25, window_bounds = array<i64: 1, 16>}, {pipeline_mode = #tpu.pipeline_mode<synchronous>, transform_indices = @transform_26, window_bounds = array<i64: 16, 16>}, {pipeline_mode = #tpu.pipeline_mode<synchronous>, transform_indices = @transform_27, window_bounds = array<i64: 1, 16>}, {pipeline_mode = #tpu.pipeline_mode<synchronous>, transform_indices = @transform_28, window_bounds = array<i64: 1, 16>}, {pipeline_mode = #tpu.pipeline_mode<synchronous>, transform_indices = @transform_29, window_bounds = array<i64: 1, 16>}, {pipeline_mode = #tpu.pipeline_mode<synchronous>, transform_indices = @transform_30, window_bounds = array<i64: 16, 4>}, {pipeline_mode = #tpu.pipeline_mode<synchronous>, transform_indices = @transform_31, window_bounds = array<i64: 1, 4>}, {transform_indices = @transform_32, window_bounds = array<i64: 8, 8>}, {transform_indices = @transform_33, window_bounds = array<i64: 8, 8>}, {transform_indices = @transform_34, window_bounds = array<i64: 8, 32>}, {transform_indices = @transform_35, window_bounds = array<i64: 8, 4>}]} {
    %c0 = arith.constant 0 : index
    %c0_0 = arith.constant 0 : index
    %0 = vector.load %arg1[%c0, %c0_0] : memref<8x32xf32, #tpu.memory_space<vmem>>, vector<8x32xf32>
    %c0_1 = arith.constant 0 : index
    %c0_2 = arith.constant 0 : index
    %1 = vector.load %arg3[%c0_1, %c0_2] : memref<32x24xf32, #tpu.memory_space<vmem>>, vector<32x24xf32>
    %cst = arith.constant dense<0.000000e+00> : vector<8x24xf32>
    %2 = tpu.matmul %0, %1, %cst {dimension_numbers = #tpu.dot_dimension_numbers<[1], [0], [0], [1], [0, 0, 1, 1], [], []>} : vector<8x32xf32>, vector<32x24xf32>, vector<8x24xf32> -> vector<8x24xf32>
    %c0_3 = arith.constant 0 : index
    %c0_4 = arith.constant 0 : index
    %3 = vector.load %arg4[%c0_3, %c0_4] : memref<1x24xf32, #tpu.memory_space<vmem>>, vector<1x24xf32>
    %4 = vector.broadcast %3 : vector<1x24xf32> to vector<8x24xf32>
    %5 = arith.addf %2, %4 : vector<8x24xf32>
    %c0_5 = arith.constant 0 : index
    %c0_6 = arith.constant 0 : index
    %6 = vector.load %arg5[%c0_5, %c0_6] : memref<1x24xf32, #tpu.memory_space<vmem>>, vector<1x24xf32>
    %7 = vector.broadcast %6 : vector<1x24xf32> to vector<8x24xf32>
    %8 = arith.mulf %5, %7 : vector<8x24xf32>
    %c0_7 = arith.constant 0 : index
    %c0_8 = arith.constant 0 : index
    %9 = vector.load %arg6[%c0_7, %c0_8] : memref<1x24xf32, #tpu.memory_space<vmem>>, vector<1x24xf32>
    %10 = vector.broadcast %9 : vector<1x24xf32> to vector<8x24xf32>
    %11 = arith.addf %8, %10 : vector<8x24xf32>
    %cst_9 = arith.constant 0.000000e+00 : f32
    %12 = vector.broadcast %cst_9 : f32 to vector<8x24xf32>
    %13 = arith.maximumf %11, %12 : vector<8x24xf32>
    %c0_10 = arith.constant 0 : index
    %c0_11 = arith.constant 0 : index
    %14 = vector.load %arg7[%c0_10, %c0_11] : memref<24x8xf32, #tpu.memory_space<vmem>>, vector<24x8xf32>
    %cst_12 = arith.constant dense<0.000000e+00> : vector<8x8xf32>
    %15 = tpu.matmul %13, %14, %cst_12 {dimension_numbers = #tpu.dot_dimension_numbers<[1], [0], [0], [1], [0, 0, 1, 1], [], []>} : vector<8x24xf32>, vector<24x8xf32>, vector<8x8xf32> -> vector<8x8xf32>
    %c0_13 = arith.constant 0 : index
    %c0_14 = arith.constant 0 : index
    %16 = vector.load %arg8[%c0_13, %c0_14] : memref<1x8xf32, #tpu.memory_space<vmem>>, vector<1x8xf32>
    %17 = vector.broadcast %16 : vector<1x8xf32> to vector<8x8xf32>
    %18 = arith.addf %15, %17 : vector<8x8xf32>
    %c0_15 = arith.constant 0 : index
    %c0_16 = arith.constant 0 : index
    %19 = vector.load %arg9[%c0_15, %c0_16] : memref<1x8xf32, #tpu.memory_space<vmem>>, vector<1x8xf32>
    %20 = vector.broadcast %19 : vector<1x8xf32> to vector<8x8xf32>
    %21 = arith.mulf %18, %20 : vector<8x8xf32>
    %c0_17 = arith.constant 0 : index
    %c0_18 = arith.constant 0 : index
    %22 = vector.load %arg10[%c0_17, %c0_18] : memref<1x8xf32, #tpu.memory_space<vmem>>, vector<1x8xf32>
    %23 = vector.broadcast %22 : vector<1x8xf32> to vector<8x8xf32>
    %24 = arith.addf %21, %23 : vector<8x8xf32>
    %c0_19 = arith.constant 0 : index
    %c0_20 = arith.constant 0 : index
    %25 = vector.load %arg11[%c0_19, %c0_20] : memref<24x8xf32, #tpu.memory_space<vmem>>, vector<24x8xf32>
    %cst_21 = arith.constant dense<0.000000e+00> : vector<8x8xf32>
    %26 = tpu.matmul %13, %25, %cst_21 {dimension_numbers = #tpu.dot_dimension_numbers<[1], [0], [0], [1], [0, 0, 1, 1], [], []>} : vector<8x24xf32>, vector<24x8xf32>, vector<8x8xf32> -> vector<8x8xf32>
    %c0_22 = arith.constant 0 : index
    %c0_23 = arith.constant 0 : index
    %27 = vector.load %arg12[%c0_22, %c0_23] : memref<1x8xf32, #tpu.memory_space<vmem>>, vector<1x8xf32>
    %28 = vector.broadcast %27 : vector<1x8xf32> to vector<8x8xf32>
    %29 = arith.addf %26, %28 : vector<8x8xf32>
    %c0_24 = arith.constant 0 : index
    %c0_25 = arith.constant 0 : index
    %30 = vector.load %arg13[%c0_24, %c0_25] : memref<1x8xf32, #tpu.memory_space<vmem>>, vector<1x8xf32>
    %31 = vector.broadcast %30 : vector<1x8xf32> to vector<8x8xf32>
    %32 = arith.mulf %29, %31 : vector<8x8xf32>
    %c0_26 = arith.constant 0 : index
    %c0_27 = arith.constant 0 : index
    %33 = vector.load %arg14[%c0_26, %c0_27] : memref<1x8xf32, #tpu.memory_space<vmem>>, vector<1x8xf32>
    %34 = vector.broadcast %33 : vector<1x8xf32> to vector<8x8xf32>
    %35 = arith.addf %32, %34 : vector<8x8xf32>
    %c0_28 = arith.constant 0 : index
    %c0_29 = arith.constant 0 : index
    %36 = vector.load %arg33[%c0_28, %c0_29] : memref<8x8xf32, #tpu.memory_space<vmem>>, vector<8x8xf32>
    tpu.vector_store %arg33[%c0_28, %c0_29], %24 {strides = array<i32>} : memref<8x8xf32, #tpu.memory_space<vmem>>, vector<8x8xf32>,
    %c0_30 = arith.constant 0 : index
    %c0_31 = arith.constant 0 : index
    %37 = vector.load %arg34[%c0_30, %c0_31] : memref<8x8xf32, #tpu.memory_space<vmem>>, vector<8x8xf32>
    tpu.vector_store %arg34[%c0_30, %c0_31], %35 {strides = array<i32>} : memref<8x8xf32, #tpu.memory_space<vmem>>, vector<8x8xf32>,
    %c0_32 = arith.constant 0 : index
    %c0_33 = arith.constant 0 : index
    %38 = vector.load %arg2[%c0_32, %c0_33] : memref<8x8xf32, #tpu.memory_space<vmem>>, vector<8x8xf32>
    %cst_34 = arith.constant 5.000000e-01 : f32
    %39 = vector.broadcast %cst_34 : f32 to vector<8x8xf32>
    %40 = arith.mulf %39, %35 : vector<8x8xf32>
    %41 = math.exp %40 : vector<8x8xf32>
    %42 = arith.mulf %38, %41 : vector<8x8xf32>
    %43 = arith.addf %24, %42 : vector<8x8xf32>
    %c0_35 = arith.constant 0 : index
    %c0_36 = arith.constant 0 : index
    %44 = vector.load %arg15[%c0_35, %c0_36] : memref<8x24xf32, #tpu.memory_space<vmem>>, vector<8x24xf32>
    %cst_37 = arith.constant dense<0.000000e+00> : vector<8x24xf32>
    %45 = tpu.matmul %43, %44, %cst_37 {dimension_numbers = #tpu.dot_dimension_numbers<[1], [0], [0], [1], [0, 0, 1, 1], [], []>} : vector<8x8xf32>, vector<8x24xf32>, vector<8x24xf32> -> vector<8x24xf32>
    %c0_38 = arith.constant 0 : index
    %c0_39 = arith.constant 0 : index
    %46 = vector.load %arg16[%c0_38, %c0_39] : memref<1x24xf32, #tpu.memory_space<vmem>>, vector<1x24xf32>
    %47 = vector.broadcast %46 : vector<1x24xf32> to vector<8x24xf32>
    %48 = arith.addf %45, %47 : vector<8x24xf32>
    %c0_40 = arith.constant 0 : index
    %c0_41 = arith.constant 0 : index
    %49 = vector.load %arg17[%c0_40, %c0_41] : memref<1x24xf32, #tpu.memory_space<vmem>>, vector<1x24xf32>
    %50 = vector.broadcast %49 : vector<1x24xf32> to vector<8x24xf32>
    %51 = arith.mulf %48, %50 : vector<8x24xf32>
    %c0_42 = arith.constant 0 : index
    %c0_43 = arith.constant 0 : index
    %52 = vector.load %arg18[%c0_42, %c0_43] : memref<1x24xf32, #tpu.memory_space<vmem>>, vector<1x24xf32>
    %53 = vector.broadcast %52 : vector<1x24xf32> to vector<8x24xf32>
    %54 = arith.addf %51, %53 : vector<8x24xf32>
    %cst_44 = arith.constant 0.000000e+00 : f32
    %55 = vector.broadcast %cst_44 : f32 to vector<8x24xf32>
    %56 = arith.maximumf %54, %55 : vector<8x24xf32>
    %c0_45 = arith.constant 0 : index
    %c0_46 = arith.constant 0 : index
    %57 = vector.load %arg19[%c0_45, %c0_46] : memref<24x32xf32, #tpu.memory_space<vmem>>, vector<24x32xf32>
    %cst_47 = arith.constant dense<0.000000e+00> : vector<8x32xf32>
    %58 = tpu.matmul %56, %57, %cst_47 {dimension_numbers = #tpu.dot_dimension_numbers<[1], [0], [0], [1], [0, 0, 1, 1], [], []>} : vector<8x24xf32>, vector<24x32xf32>, vector<8x32xf32> -> vector<8x32xf32>
    %c0_48 = arith.constant 0 : index
    %c0_49 = arith.constant 0 : index
    %59 = vector.load %arg20[%c0_48, %c0_49] : memref<1x32xf32, #tpu.memory_space<vmem>>, vector<1x32xf32>
    %60 = vector.broadcast %59 : vector<1x32xf32> to vector<8x32xf32>
    %61 = arith.addf %58, %60 : vector<8x32xf32>
    %c0_50 = arith.constant 0 : index
    %c0_51 = arith.constant 0 : index
    %62 = vector.load %arg21[%c0_50, %c0_51] : memref<1x32xf32, #tpu.memory_space<vmem>>, vector<1x32xf32>
    %63 = vector.broadcast %62 : vector<1x32xf32> to vector<8x32xf32>
    %64 = arith.mulf %61, %63 : vector<8x32xf32>
    %c0_52 = arith.constant 0 : index
    %c0_53 = arith.constant 0 : index
    %65 = vector.load %arg22[%c0_52, %c0_53] : memref<1x32xf32, #tpu.memory_space<vmem>>, vector<1x32xf32>
    %66 = vector.broadcast %65 : vector<1x32xf32> to vector<8x32xf32>
    %67 = arith.addf %64, %66 : vector<8x32xf32>
    %cst_54 = arith.constant 0.000000e+00 : f32
    %68 = vector.broadcast %cst_54 : f32 to vector<8x32xf32>
    %69 = arith.subf %68, %67 : vector<8x32xf32>
    %70 = math.exp %69 : vector<8x32xf32>
    %cst_55 = arith.constant 1.000000e+00 : f32
    %71 = vector.broadcast %cst_55 : f32 to vector<8x32xf32>
    %72 = arith.addf %71, %70 : vector<8x32xf32>
    %cst_56 = arith.constant 1.000000e+00 : f32
    %73 = vector.broadcast %cst_56 : f32 to vector<8x32xf32>
    %74 = arith.divf %73, %72 : vector<8x32xf32>
    %c0_57 = arith.constant 0 : index
    %c0_58 = arith.constant 0 : index
    %75 = vector.load %arg35[%c0_57, %c0_58] : memref<8x32xf32, #tpu.memory_space<vmem>>, vector<8x32xf32>
    tpu.vector_store %arg35[%c0_57, %c0_58], %74 {strides = array<i32>} : memref<8x32xf32, #tpu.memory_space<vmem>>, vector<8x32xf32>,
    %c0_59 = arith.constant 0 : index
    %c0_60 = arith.constant 0 : index
    %76 = vector.load %arg23[%c0_59, %c0_60] : memref<8x16xf32, #tpu.memory_space<vmem>>, vector<8x16xf32>
    %cst_61 = arith.constant dense<0.000000e+00> : vector<8x16xf32>
    %77 = tpu.matmul %24, %76, %cst_61 {dimension_numbers = #tpu.dot_dimension_numbers<[1], [0], [0], [1], [0, 0, 1, 1], [], []>} : vector<8x8xf32>, vector<8x16xf32>, vector<8x16xf32> -> vector<8x16xf32>
    %c0_62 = arith.constant 0 : index
    %c0_63 = arith.constant 0 : index
    %78 = vector.load %arg24[%c0_62, %c0_63] : memref<1x16xf32, #tpu.memory_space<vmem>>, vector<1x16xf32>
    %79 = vector.broadcast %78 : vector<1x16xf32> to vector<8x16xf32>
    %80 = arith.addf %77, %79 : vector<8x16xf32>
    %c0_64 = arith.constant 0 : index
    %c0_65 = arith.constant 0 : index
    %81 = vector.load %arg25[%c0_64, %c0_65] : memref<1x16xf32, #tpu.memory_space<vmem>>, vector<1x16xf32>
    %82 = vector.broadcast %81 : vector<1x16xf32> to vector<8x16xf32>
    %83 = arith.mulf %80, %82 : vector<8x16xf32>
    %c0_66 = arith.constant 0 : index
    %c0_67 = arith.constant 0 : index
    %84 = vector.load %arg26[%c0_66, %c0_67] : memref<1x16xf32, #tpu.memory_space<vmem>>, vector<1x16xf32>
    %85 = vector.broadcast %84 : vector<1x16xf32> to vector<8x16xf32>
    %86 = arith.addf %83, %85 : vector<8x16xf32>
    %cst_68 = arith.constant 0.000000e+00 : f32
    %87 = vector.broadcast %cst_68 : f32 to vector<8x16xf32>
    %88 = arith.maximumf %86, %87 : vector<8x16xf32>
    %c0_69 = arith.constant 0 : index
    %c0_70 = arith.constant 0 : index
    %89 = vector.load %arg27[%c0_69, %c0_70] : memref<16x16xf32, #tpu.memory_space<vmem>>, vector<16x16xf32>
    %cst_71 = arith.constant dense<0.000000e+00> : vector<8x16xf32>
    %90 = tpu.matmul %88, %89, %cst_71 {dimension_numbers = #tpu.dot_dimension_numbers<[1], [0], [0], [1], [0, 0, 1, 1], [], []>} : vector<8x16xf32>, vector<16x16xf32>, vector<8x16xf32> -> vector<8x16xf32>
    %c0_72 = arith.constant 0 : index
    %c0_73 = arith.constant 0 : index
    %91 = vector.load %arg28[%c0_72, %c0_73] : memref<1x16xf32, #tpu.memory_space<vmem>>, vector<1x16xf32>
    %92 = vector.broadcast %91 : vector<1x16xf32> to vector<8x16xf32>
    %93 = arith.addf %90, %92 : vector<8x16xf32>
    %c0_74 = arith.constant 0 : index
    %c0_75 = arith.constant 0 : index
    %94 = vector.load %arg29[%c0_74, %c0_75] : memref<1x16xf32, #tpu.memory_space<vmem>>, vector<1x16xf32>
    %95 = vector.broadcast %94 : vector<1x16xf32> to vector<8x16xf32>
    %96 = arith.mulf %93, %95 : vector<8x16xf32>
    %c0_76 = arith.constant 0 : index
    %c0_77 = arith.constant 0 : index
    %97 = vector.load %arg30[%c0_76, %c0_77] : memref<1x16xf32, #tpu.memory_space<vmem>>, vector<1x16xf32>
    %98 = vector.broadcast %97 : vector<1x16xf32> to vector<8x16xf32>
    %99 = arith.addf %96, %98 : vector<8x16xf32>
    %cst_78 = arith.constant 0.000000e+00 : f32
    %100 = vector.broadcast %cst_78 : f32 to vector<8x16xf32>
    %101 = arith.maximumf %99, %100 : vector<8x16xf32>
    %c0_79 = arith.constant 0 : index
    %c0_80 = arith.constant 0 : index
    %102 = vector.load %arg31[%c0_79, %c0_80] : memref<16x4xf32, #tpu.memory_space<vmem>>, vector<16x4xf32>
    %cst_81 = arith.constant dense<0.000000e+00> : vector<8x4xf32>
    %103 = tpu.matmul %101, %102, %cst_81 {dimension_numbers = #tpu.dot_dimension_numbers<[1], [0], [0], [1], [0, 0, 1, 1], [], []>} : vector<8x16xf32>, vector<16x4xf32>, vector<8x4xf32> -> vector<8x4xf32>
    %c0_82 = arith.constant 0 : index
    %c0_83 = arith.constant 0 : index
    %104 = vector.load %arg32[%c0_82, %c0_83] : memref<1x4xf32, #tpu.memory_space<vmem>>, vector<1x4xf32>
    %105 = vector.broadcast %104 : vector<1x4xf32> to vector<8x4xf32>
    %106 = arith.addf %103, %105 : vector<8x4xf32>
    %cst_84 = arith.constant dense<0xFF800000> : vector<8xf32>
    %107 = vector.multi_reduction <maximumf>, %106, %cst_84 [1] : vector<8x4xf32> to vector<8xf32>
    %108 = vector.shape_cast %107 : vector<8xf32> to vector<8x1xf32>
    %109 = vector.broadcast %108 : vector<8x1xf32> to vector<8x4xf32>
    %110 = arith.subf %106, %109 : vector<8x4xf32>
    %111 = math.exp %110 : vector<8x4xf32>
    %cst_85 = arith.constant dense<0.000000e+00> : vector<8xf32>
    %112 = vector.multi_reduction <add>, %111, %cst_85 [1] : vector<8x4xf32> to vector<8xf32>
    %113 = vector.shape_cast %112 : vector<8xf32> to vector<8x1xf32>
    %114 = vector.broadcast %113 : vector<8x1xf32> to vector<8x4xf32>
    %115 = arith.divf %111, %114 : vector<8x4xf32>
    %c0_86 = arith.constant 0 : index
    %c0_87 = arith.constant 0 : index
    %116 = vector.load %arg36[%c0_86, %c0_87] : memref<8x4xf32, #tpu.memory_space<vmem>>, vector<8x4xf32>
    tpu.vector_store %arg36[%c0_86, %c0_87], %115 {strides = array<i32>} : memref<8x4xf32, #tpu.memory_space<vmem>>, vector<8x4xf32>,
    return
  }
  func.func @transform_0(%arg0: i32) -> (i32, i32) {
    %c0_i32 = arith.constant 0 : i32
    %c0_i32_0 = arith.constant 0 : i32
    return %arg0, %c0_i32 : i32, i32
  }
  func.func @transform_1(%arg0: i32) -> (i32, i32) {
    %c0_i32 = arith.constant 0 : i32
    %c0_i32_0 = arith.constant 0 : i32
    return %arg0, %c0_i32 : i32, i32
  }
  func.func @transform_2(%arg0: i32) -> (i32, i32) {
    %c0_i32 = arith.constant 0 : i32
    %c0_i32_0 = arith.constant 0 : i32
    %c0_i32_1 = arith.constant 0 : i32
    return %c0_i32, %c0_i32_0 : i32, i32
  }
  func.func @transform_3(%arg0: i32) -> (i32, i32) {
    %c0_i32 = arith.constant 0 : i32
    %c0_i32_0 = arith.constant 0 : i32
    %c0_i32_1 = arith.constant 0 : i32
    return %c0_i32, %c0_i32_0 : i32, i32
  }
  func.func @transform_4(%arg0: i32) -> (i32, i32) {
    %c0_i32 = arith.constant 0 : i32
    %c0_i32_0 = arith.constant 0 : i32
    %c0_i32_1 = arith.constant 0 : i32
    return %c0_i32, %c0_i32_0 : i32, i32
  }
  func.func @transform_5(%arg0: i32) -> (i32, i32) {
    %c0_i32 = arith.constant 0 : i32
    %c0_i32_0 = arith.constant 0 : i32
    %c0_i32_1 = arith.constant 0 : i32
    return %c0_i32, %c0_i32_0 : i32, i32
  }
  func.func @transform_6(%arg0: i32) -> (i32, i32) {
    %c0_i32 = arith.constant 0 : i32
    %c0_i32_0 = arith.constant 0 : i32
    %c0_i32_1 = arith.constant 0 : i32
    return %c0_i32, %c0_i32_0 : i32, i32
  }
  func.func @transform_7(%arg0: i32) -> (i32, i32) {
    %c0_i32 = arith.constant 0 : i32
    %c0_i32_0 = arith.constant 0 : i32
    %c0_i32_1 = arith.constant 0 : i32
    return %c0_i32, %c0_i32_0 : i32, i32
  }
  func.func @transform_8(%arg0: i32) -> (i32, i32) {
    %c0_i32 = arith.constant 0 : i32
    %c0_i32_0 = arith.constant 0 : i32
    %c0_i32_1 = arith.constant 0 : i32
    return %c0_i32, %c0_i32_0 : i32, i32
  }
  func.func @transform_9(%arg0: i32) -> (i32, i32) {
    %c0_i32 = arith.constant 0 : i32
    %c0_i32_0 = arith.constant 0 : i32
    %c0_i32_1 = arith.constant 0 : i32
    return %c0_i32, %c0_i32_0 : i32, i32
  }
  func.func @transform_10(%arg0: i32) -> (i32, i32) {
    %c0_i32 = arith.constant 0 : i32
    %c0_i32_0 = arith.constant 0 : i32
    %c0_i32_1 = arith.constant 0 : i32
    return %c0_i32, %c0_i32_0 : i32, i32
  }
  func.func @transform_11(%arg0: i32) -> (i32, i32) {
    %c0_i32 = arith.constant 0 : i32
    %c0_i32_0 = arith.constant 0 : i32
    %c0_i32_1 = arith.constant 0 : i32
    return %c0_i32, %c0_i32_0 : i32, i32
  }
  func.func @transform_12(%arg0: i32) -> (i32, i32) {
    %c0_i32 = arith.constant 0 : i32
    %c0_i32_0 = arith.constant 0 : i32
    %c0_i32_1 = arith.constant 0 : i32
    return %c0_i32, %c0_i32_0 : i32, i32
  }
  func.func @transform_13(%arg0: i32) -> (i32, i32) {
    %c0_i32 = arith.constant 0 : i32
    %c0_i32_0 = arith.constant 0 : i32
    %c0_i32_1 = arith.constant 0 : i32
    return %c0_i32, %c0_i32_0 : i32, i32
  }
  func.func @transform_14(%arg0: i32) -> (i32, i32) {
    %c0_i32 = arith.constant 0 : i32
    %c0_i32_0 = arith.constant 0 : i32
    %c0_i32_1 = arith.constant 0 : i32
    return %c0_i32, %c0_i32_0 : i32, i32
  }
  func.func @transform_15(%arg0: i32) -> (i32, i32) {
    %c0_i32 = arith.constant 0 : i32
    %c0_i32_0 = arith.constant 0 : i32
    %c0_i32_1 = arith.constant 0 : i32
    return %c0_i32, %c0_i32_0 : i32, i32
  }
  func.func @transform_16(%arg0: i32) -> (i32, i32) {
    %c0_i32 = arith.constant 0 : i32
    %c0_i32_0 = arith.constant 0 : i32
    %c0_i32_1 = arith.constant 0 : i32
    return %c0_i32, %c0_i32_0 : i32, i32
  }
  func.func @transform_17(%arg0: i32) -> (i32, i32) {
    %c0_i32 = arith.constant 0 : i32
    %c0_i32_0 = arith.constant 0 : i32
    %c0_i32_1 = arith.constant 0 : i32
    return %c0_i32, %c0_i32_0 : i32, i32
  }
  func.func @transform_18(%arg0: i32) -> (i32, i32) {
    %c0_i32 = arith.constant 0 : i32
    %c0_i32_0 = arith.constant 0 : i32
    %c0_i32_1 = arith.constant 0 : i32
    return %c0_i32, %c0_i32_0 : i32, i32
  }
  func.func @transform_19(%arg0: i32) -> (i32, i32) {
    %c0_i32 = arith.constant 0 : i32
    %c0_i32_0 = arith.constant 0 : i32
    %c0_i32_1 = arith.constant 0 : i32
    return %c0_i32, %c0_i32_0 : i32, i32
  }
  func.func @transform_20(%arg0: i32) -> (i32, i32) {
    %c0_i32 = arith.constant 0 : i32
    %c0_i32_0 = arith.constant 0 : i32
    %c0_i32_1 = arith.constant 0 : i32
    return %c0_i32, %c0_i32_0 : i32, i32
  }
  func.func @transform_21(%arg0: i32) -> (i32, i32) {
    %c0_i32 = arith.constant 0 : i32
    %c0_i32_0 = arith.constant 0 : i32
    %c0_i32_1 = arith.constant 0 : i32
    return %c0_i32, %c0_i32_0 : i32, i32
  }
  func.func @transform_22(%arg0: i32) -> (i32, i32) {
    %c0_i32 = arith.constant 0 : i32
    %c0_i32_0 = arith.constant 0 : i32
    %c0_i32_1 = arith.constant 0 : i32
    return %c0_i32, %c0_i32_0 : i32, i32
  }
  func.func @transform_23(%arg0: i32) -> (i32, i32) {
    %c0_i32 = arith.constant 0 : i32
    %c0_i32_0 = arith.constant 0 : i32
    %c0_i32_1 = arith.constant 0 : i32
    return %c0_i32, %c0_i32_0 : i32, i32
  }
  func.func @transform_24(%arg0: i32) -> (i32, i32) {
    %c0_i32 = arith.constant 0 : i32
    %c0_i32_0 = arith.constant 0 : i32
    %c0_i32_1 = arith.constant 0 : i32
    return %c0_i32, %c0_i32_0 : i32, i32
  }
  func.func @transform_25(%arg0: i32) -> (i32, i32) {
    %c0_i32 = arith.constant 0 : i32
    %c0_i32_0 = arith.constant 0 : i32
    %c0_i32_1 = arith.constant 0 : i32
    return %c0_i32, %c0_i32_0 : i32, i32
  }
  func.func @transform_26(%arg0: i32) -> (i32, i32) {
    %c0_i32 = arith.constant 0 : i32
    %c0_i32_0 = arith.constant 0 : i32
    %c0_i32_1 = arith.constant 0 : i32
    return %c0_i32, %c0_i32_0 : i32, i32
  }
  func.func @transform_27(%arg0: i32) -> (i32, i32) {
    %c0_i32 = arith.constant 0 : i32
    %c0_i32_0 = arith.constant 0 : i32
    %c0_i32_1 = arith.constant 0 : i32
    return %c0_i32, %c0_i32_0 : i32, i32
  }
  func.func @transform_28(%arg0: i32) -> (i32, i32) {
    %c0_i32 = arith.constant 0 : i32
    %c0_i32_0 = arith.constant 0 : i32
    %c0_i32_1 = arith.constant 0 : i32
    return %c0_i32, %c0_i32_0 : i32, i32
  }
  func.func @transform_29(%arg0: i32) -> (i32, i32) {
    %c0_i32 = arith.constant 0 : i32
    %c0_i32_0 = arith.constant 0 : i32
    %c0_i32_1 = arith.constant 0 : i32
    return %c0_i32, %c0_i32_0 : i32, i32
  }
  func.func @transform_30(%arg0: i32) -> (i32, i32) {
    %c0_i32 = arith.constant 0 : i32
    %c0_i32_0 = arith.constant 0 : i32
    %c0_i32_1 = arith.constant 0 : i32
    return %c0_i32, %c0_i32_0 : i32, i32
  }
  func.func @transform_31(%arg0: i32) -> (i32, i32) {
    %c0_i32 = arith.constant 0 : i32
    %c0_i32_0 = arith.constant 0 : i32
    %c0_i32_1 = arith.constant 0 : i32
    return %c0_i32, %c0_i32_0 : i32, i32
  }
  func.func @transform_32(%arg0: i32) -> (i32, i32) {
    %c0_i32 = arith.constant 0 : i32
    %c0_i32_0 = arith.constant 0 : i32
    return %arg0, %c0_i32 : i32, i32
  }
  func.func @transform_33(%arg0: i32) -> (i32, i32) {
    %c0_i32 = arith.constant 0 : i32
    %c0_i32_0 = arith.constant 0 : i32
    return %arg0, %c0_i32 : i32, i32
  }
  func.func @transform_34(%arg0: i32) -> (i32, i32) {
    %c0_i32 = arith.constant 0 : i32
    %c0_i32_0 = arith.constant 0 : i32
    return %arg0, %c0_i32 : i32, i32
  }
  func.func @transform_35(%arg0: i32) -> (i32, i32) {
    %c0_i32 = arith.constant 0 : i32
    %c0_i32_0 = arith.constant 0 : i32
    return %arg0, %c0_i32 : i32, i32
  }
}

</mosaic_0001>

<bundles_post_ra>
// kernel: tpu_custom_call.1
= control target key start
LH: loop header
LB: loop body
LE: loop exit
PB: predicated region body
PF: predicated region fallthrough
CT: control target
= control target key end

     0   :  { %s1289_s6 = smov 1   ;;  %s1290_s10 = smov 2   ;;  %s1613_s0 = inlined_call_operand.smem [shape: u32[36], index: -1, kind: input, shape index: {}] }
   0x1   :  { %s1338_s5 = sld [smem:[%s1613_s0]]   ;;  %s1291_s14 = smov 3  }
   0x2   :  { %s1343_s9 = sld [smem:[%s1613_s0 + %s1289_s6]]   ;;  %s1292_s18 = smov 4  }
   0x3   :  { %s1348_s13 = sld [smem:[%s1613_s0 + %s1290_s10]]   ;;  %s1293_s22 = smov 5  }
   0x4   :  { %s1353_s17 = sld [smem:[%s1613_s0 + %s1291_s14]]   ;;  %s1294_s26 = smov 6  }
   0x5   :  { %s1358_s21 = sld [smem:[%s1613_s0 + %s1292_s18]]   ;;  %s1295_s30 = smov 7  }
   0x6   :  { %s1363_s25 = sld [smem:[%s1613_s0 + %s1293_s22]]   ;;  %s1296_s4 = smov 8  }
   0x7   :  { %s1368_s29 = sld [smem:[%s1613_s0 + %s1294_s26]]   ;;  %s1297_s10 = smov 9  }
   0x8   :  { %1617 = sst [smem:[#allocation9_spill]] %s1343_s9  ;;  %s1298_s15 = smov 10  }
   0x9   :  { %s1373_s3 = sld [smem:[%s1613_s0 + %s1295_s30]]   ;;  %s1299_s20 = smov 11  }
   0xa   :  { %s1378_s8 = sld [smem:[%s1613_s0 + %s1296_s4]]   ;;  %s1300_s26 = smov 12  }
   0xb   :  { %s1383_s14 = sld [smem:[%s1613_s0 + %s1297_s10]]   ;;  %s1301_s1 = smov 13  }
   0xc   :  { %s1388_s19 = sld [smem:[%s1613_s0 + %s1298_s15]]   ;;  %s1302_s7 = smov 14  }
   0xd   :  { %s1393_s24 = sld [smem:[%s1613_s0 + %s1299_s20]]   ;;  %s1303_s15 = smov 15  }
   0xe   :  { %s1398_s30 = sld [smem:[%s1613_s0 + %s1300_s26]]   ;;  %s1304_s22 = smov 16  }
   0xf   :  { %s1403_s6 = sld [smem:[%s1613_s0 + %s1301_s1]]   ;;  %s1305_s28 = smov 17  }
  0x10   :  { %s1408_s12 = sld [smem:[%s1613_s0 + %s1302_s7]]   ;;  %s1306_s7 = smov 18  }
  0x11   :  { %s1413_s20 = sld [smem:[%s1613_s0 + %s1303_s15]]   ;;  %s1307_s15 = smov 19  }
  0x12   :  { %s1418_s27 = sld [smem:[%s1613_s0 + %s1304_s22]]   ;;  %s1308_s22 = smov 20  }
  0x13   :  { %s1423_s4 = sld [smem:[%s1613_s0 + %s1305_s28]]   ;;  %s1309_s28 = smov 21  }
  0x14   :  { %s1428_s9 = sld [smem:[%s1613_s0 + %s1306_s7]]   ;;  %s1310_s7 = smov 22  }
  0x15   :  { %1618 = sst [smem:[#allocation10_spill]] %s1403_s6 }
  0x17   :  { %1619 = sst [smem:[#allocation11_spill]] %s1413_s20 }
  0x18   :  { %1620 = sst [smem:[#allocation12_spill]] %s1418_s27 }
  0x19   :  { %1621 = sst [smem:[#allocation13_spill]] %s1423_s4 }
  0x1a   :  { %1622 = sst [smem:[#allocation14_spill]] %s1428_s9 }
  0x1b   :  { %s1433_s20 = sld [smem:[%s1613_s0 + %s1307_s15]]   ;;  %s1311_s15 = smov 23  }
  0x1c   :  { %s1438_s27 = sld [smem:[%s1613_s0 + %s1308_s22]]   ;;  %s1312_s22 = smov 24  }
  0x1d   :  { %s1443_s4 = sld [smem:[%s1613_s0 + %s1309_s28]]   ;;  %s1313_s28 = smov 25  }
  0x1e   :  { %s1448_s9 = sld [smem:[%s1613_s0 + %s1310_s7]]   ;;  %s1314_s7 = smov 26  }
  0x1f   :  { %s1468_s6 = sld [smem:[%s1613_s0 + %s1314_s7]]   ;;  %s1318_s7 = smov 30  }
  0x21   :  { %1623 = sst [smem:[#allocation15_spill]] %s1433_s20 }
  0x22   :  { %1624 = sst [smem:[#allocation16_spill]] %s1438_s27 }
  0x23   :  { %1625 = sst [smem:[#allocation17_spill]] %s1443_s4 }
  0x24   :  { %s1453_s20 = sld [smem:[%s1613_s0 + %s1311_s15]]   ;;  %s1315_s15 = smov 27  }
  0x25   :  { %s1458_s27 = sld [smem:[%s1613_s0 + %s1312_s22]]   ;;  %s1316_s22 = smov 28  }
  0x26   :  { %s1463_s4 = sld [smem:[%s1613_s0 + %s1313_s28]]   ;;  %s1317_s28 = smov 29  }
  0x27   :  { %1629 = sst [smem:[#allocation21_spill]] %s1468_s6 }
  0x28   :  { %s1488_s6 = sld [smem:[%s1613_s0 + %s1318_s7]]   ;;  %s1322_s7 = smov 34  }
  0x2a   :  { %1626 = sst [smem:[#allocation18_spill]] %s1453_s20 }
  0x2b   :  { %1627 = sst [smem:[#allocation19_spill]] %s1458_s27 }
  0x2c   :  { %1628 = sst [smem:[#allocation20_spill]] %s1463_s4 }
  0x2d   :  { %s1473_s20 = sld [smem:[%s1613_s0 + %s1315_s15]]   ;;  %s1319_s15 = smov 31  }
  0x2e   :  { %s1478_s27 = sld [smem:[%s1613_s0 + %s1316_s22]]   ;;  %s1320_s22 = smov 32  }
  0x2f   :  { %s1483_s4 = sld [smem:[%s1613_s0 + %s1317_s28]]   ;;  %s1321_s28 = smov 33  }
  0x30   :  { %1633 = sst [smem:[#allocation25_spill]] %s1488_s6 }
  0x31   :  { %s1508_s6 = sld [smem:[%s1613_s0 + %s1322_s7]]  }
  0x33   :  { %1630 = sst [smem:[#allocation22_spill]] %s1473_s20 }
  0x34   :  { %1631 = sst [smem:[#allocation23_spill]] %s1478_s27 }
  0x35   :  { %1632 = sst [smem:[#allocation24_spill]] %s1483_s4 }
  0x36   :  { %s1493_s20 = sld [smem:[%s1613_s0 + %s1319_s15]]   ;;  %s1323_s15 = smov 35  }
  0x37   :  { %s1498_s27 = sld [smem:[%s1613_s0 + %s1320_s22]]  }
  0x38   :  { %s1503_s4 = sld [smem:[%s1613_s0 + %s1321_s28]]  }
  0x3c   :  { %1634 = sst [smem:[#allocation26_spill]] %s1493_s20 }
  0x3d   :  { %s1513_s20 = sld [smem:[%s1613_s0 + %s1323_s15]]  }
  0x3e   :  { %77 = vsyncpa [#allocation3], 0  ;;  %v144_v0 = vld [vmem:[%s1348_s13] sm:$0xff]  ;;  %v145_v1 = vld [vmem:[%s1348_s13 + $0x8] sm:$0xff]  ;;  %v1324_v3 = vmov 0.0|0.0   ;;  %vm1325_vm0 = vmmov 0  }
  0x3f   :  { %v146_v2 = vld [vmem:[%s1348_s13 + $0x10] sm:$0xff]  ;;  %1147 = vmatprep.subr.bf16.mxu0 %v1324_v3  ;;  %v1148_v4 = vpack.c.bf16 %v145_v1, %v144_v0  ;;  %v147_v5 = vld [vmem:[%s1348_s13 + $0x18] sm:$0xff]  ;;  %v1326_v6 = vmov 0.0   ;;  %1153 = vmatprep.subr.bf16.mxu1 %v1324_v3 }
  0x40   :  { %1093 = vmatprep.mubr.msk.f32.mxu0 %vm1325_vm0, %v1326_v6  ;;  %1102 = vmatprep.mubr.msk.f32.mxu1 %vm1325_vm0, %v1326_v6 }
  0x41   :  { %78 = vsyncpa [#allocation5], 0  ;;  %1149 = vmatpush3.bf16.msra.mxu0 %v1148_v4  ;;  %v1151_v7 = vpack.c.bf16 %v147_v5, %v146_v2  ;;  %v143_v8 = vld [vmem:[%s1338_s5] sm:$0xff]  ;;  %vm155_vm1 = vcmask 261120   ;;  %v247_v10 = vld [vmem:[%s1368_s29 + $0x8] sm:$0xff]  ;;  %vm256_vm2 = vcmask 195584  }
  0x42   :  { %1150 = vmatprep.subr.bf16.mxu0 %v1324_v3  ;;  %v246_v9 = vld [vmem:[%s1368_s29] sm:$0xff]  ;;  %v248_v12 = vld [vmem:[%s1368_s29 + $0x10] sm:$0xff]  ;;  %v347_v21 = vld [vmem:[%s1388_s19 + $0x8] sm:$0xff]  ;;  %s1635_s0 = sld [smem:[#allocation10_spill]]  ;;  %vm442_vm3 = vcmask 64512   ;;  %s1636_s5 = sld [smem:[#allocation9_spill]] }
  0x43   :  { %v1154_v11 = vpack.c.bf16 %v247_v10, %v246_v9  ;;  %v1028_v13 = vld [vmem:[%s1353_s17] ss:$0 sm:$0xff]  ;;  %v348_v25 = vld [vmem:[%s1388_s19 + $0x10] sm:$0xff]  ;;  %s1638_s13 = sld [smem:[#allocation14_spill]]  ;;  %s1639_s17 = sld [smem:[#allocation18_spill]]  ;;  %vm762_vm4 = vcmask 130048  }
  0x44   :  { %v1030_v15 = vld [vmem:[%s1358_s21] ss:$0 sm:$0xff]  ;;  %s1640_s21 = sld [smem:[#allocation19_spill]]  ;;  %s1650_s22 = sld [smem:[#allocation16_spill]]  ;;  %vm935_vm5 = vcmask 31744  }
  0x45   :  { %1152 = vmatpush3.bf16.msra.mxu0 %v1151_v7  ;;  %1155 = vmatpush3.bf16.msra.mxu1 %v1154_v11  ;;  %v1031_v18 = vld [vmem:[%s1363_s25] ss:$0 sm:$0xff]  ;;  %s1641_s25 = sld [smem:[#allocation20_spill]]  ;;  %s1642_s29 = sld [smem:[#allocation11_spill]] }
  0x46   :  { %1114 = vmatprep.subr.mxu0 %v1326_v6  ;;  %1100 = vmatprep.subr.mxu1 %v1326_v6  ;;  %v346_v20 = vld [vmem:[%s1388_s19] sm:$0xff]  ;;  %s1646_s19 = sld [smem:[#allocation22_spill]]  ;;  %s1651_s23 = sld [smem:[#allocation17_spill]] }
  0x47   :  { %v1157_v23 = vpack.c.bf16 %v347_v21, %v346_v20  ;;  %v655_v26 = vld [vmem:[%s1448_s9] sm:$0xff]  ;;  %s1637_s9 = sld [smem:[#allocation21_spill]]  ;;  %s1652_s26 = sld [smem:[#allocation26_spill]] }
  0x48   :  { %1094 = vmatmul.mubr.msk.f32.vlgmr.msra.gmra.mrb[0].mxu0 %vm155_vm1, %v143_v8  ;;  %v451_v27 = vld [vmem:[%s1408_s12] sm:$0xff]  ;;  %s1649_s12 = sld [smem:[#allocation15_spill]]  ;;  %s1327_s28 = smov [#allocation4]  }
  0x49   :  { %1116 = vmatprep.mubr.msk.f32.mxu0 %vm1325_vm0, %v1326_v6  ;;  %1101 = vmatpush3.msra.mxu1 %v248_v12  ;;  %v1032_v28 = vld [vmem:[%s1373_s3] ss:$0 sm:$0xff]  ;;  %v550_v54 = vld [vmem:[%s1638_s13 + $0x8] sm:$0xff]  ;;  %v551_v56 = vld [vmem:[%s1638_s13 + $0x10] sm:$0xff]  ;;  %s1643_s3 = sld [smem:[#allocation12_spill]]  ;;  %s964_s1 = sshll.u32 %s1327_s28, 4  ;;  %s965_s1 = int_to_ptr.vmem [resolvable:$true] %s964_s1 }
  0x4a   :  { %1156 = vmatprep.subr.bf16.mxu1 %v1324_v3  ;;  %1115 = vmatpush3.msra.mxu0 %v451_v27  ;;  %v1034_v30 = vld [vmem:[%s1378_s8] ss:$0 sm:$0xff]  ;;  %s1644_s8 = sld [smem:[#allocation13_spill]]  ;;  %s1328_s2 = smov [#allocation2]  }
  0x4b   :  { %1159 = vmatprep.subr.bf16.mxu0 %v1324_v3  ;;  %v1035_v33 = vld [vmem:[%s1383_s14] ss:$0 sm:$0xff]  ;;  %s1645_s14 = sld [smem:[#allocation25_spill]]  ;;  %s954_s7 = sshll.u32 %s1328_s2, 4  ;;  %s955_s7 = int_to_ptr.vmem [resolvable:$true] %s954_s7 }
  0x4c   :  { %v1036_v35 = vld [vmem:[%s1393_s24] ss:$0 sm:$0xff]  ;;  %s1647_s24 = sld [smem:[#allocation23_spill]]  ;;  %s1219_s10 = scalar_lea.vmem %s965_s1, 128 }
  0x4d   :  { %v1038_v38 = vld [vmem:[%s1398_s30] ss:$0 sm:$0xff]  ;;  %v754_v51 = vld [vmem:[%s1637_s9 + $0x8] sm:$0xff]  ;;  %s1648_s30 = sld [smem:[#allocation24_spill]]  ;;  %p1220_p0 = scmp.ne.s32.totalorder %s965_s1, %s1219_s10 }
  0x4e   :  { %v1039_v41 = vld [vmem:[%s1635_s0] ss:$0 sm:$0xff]  ;;  %p1224_p1 = scmp.lt.s32.totalorder %s965_s1, %s965_s1  ;;  %p1225_p2 = scmp.lt.s32.totalorder %s1219_s10, %s1219_s10 }
  0x4f   :  { %v445_v46 = vld [vmem:[%s1636_s5] sm:$0xff] }
  0x50   :  { %v753_v50 = vld [vmem:[%s1637_s9] sm:$0xff]  ;;  %p1226_p3 = por %p1225_p2, %p1224_p1 }
  0x51   :  { %v1163_v52 = vpack.c.bf16 %v754_v51, %v753_v50  ;;  %v549_v53 = vld [vmem:[%s1638_s13] sm:$0xff] }
  0x52   :  { %v1160_v55 = vpack.c.bf16 %v550_v54, %v549_v53  ;;  %v1048_v57 = vld [vmem:[%s1639_s17] ss:$0 sm:$0xff]  ;;  %p1227_p4 = pnand %p1226_p3, %p1220_p0 }
  0x53   :  { %v1050_v59 = vld [vmem:[%s1640_s21] ss:$0 sm:$0xff] }
  0x54   :  { %v1051_v62 = vld [vmem:[%s1641_s25] ss:$0 sm:$0xff] }
  0x55   :  { %v1040_v2 = vld [vmem:[%s1642_s29] ss:$0 sm:$0xff] }
  0x56   :  { %v1043_v8 = vld [vmem:[%s1644_s8] ss:$0 sm:$0xff] }
  0x57   :  { %v853_v12 = vld [vmem:[%s1645_s14] sm:$0xff] }
  0x58   :  { %v1055_v20 = vld [vmem:[%s1648_s30] ss:$0 sm:$0xff] }
 0x11b   :  { %v225_v14 = vpop.f32.mrb[0].mxu0 }
 0x11c   :  { %v226_v16 = vadd.f32 %v1028_v13, %v225_v14  ;;  %v1095_v17 = vpop.f32.mrb[1].mxu0  ;;  %v854_v13 = vld [vmem:[%s1645_s14 + $0x8] sm:$0xff] }
 0x11d   :  { %v1166_v14 = vpack.c.bf16 %v854_v13, %v853_v12  ;;  %v1054_v17 = vld [vmem:[%s1647_s24] ss:$0 sm:$0xff] }
 0x11e   :  { %v236_v19 = vmul.f32 %v1030_v15, %v226_v16  ;;  %v1052_v15 = vld [vmem:[%s1646_s19] ss:$0 sm:$0xff] }
 0x120   :  { %v244_v22 = vadd.f32 %v1031_v18, %v236_v19 }
 0x122   :  { %v245_v24 = vmax.f32 %v244_v22, 0.0 }
 0x124   :  { %1103 = vmatmul.mubr.msk.f32.vlgmr.msra.gmra.mrb[0].mxu1 %vm256_vm2, %v245_v24 }
 0x125   :  { %1158 = vmatpush3.bf16.msra.mxu1 %v1157_v23  ;;  %1111 = vmatprep.mubr.msk.f32.mxu1 %vm1325_vm0, %v1326_v6 }
 0x126   :  { %1109 = vmatprep.subr.mxu1 %v1326_v6 }
 0x129   :  { %1110 = vmatpush3.msra.mxu1 %v348_v25  ;;  %v1046_v25 = vld [vmem:[%s1650_s22] ss:$0 sm:$0xff] }
 0x12a   :  { %1112 = vmatmul.mubr.msk.f32.vlgmr.msra.gmra.mrb[2].mxu1 %vm256_vm2, %v245_v24  ;;  %1128 = vmatprep.subr.mxu1 %v1326_v6  ;;  %v1044_v24 = vld [vmem:[%s1649_s12] ss:$0 sm:$0xff] }
 0x12b   :  { %1130 = vmatprep.mubr.msk.f32.mxu1 %vm1325_vm0, %v1326_v6  ;;  %1129 = vmatpush3.msra.mxu1 %v655_v26 }
 0x12c   :  { %1162 = vmatprep.subr.bf16.mxu1 %v1324_v3 }
 0x1f7   :  { %v326_v29 = vpop.f32.mrb[0].mxu1 }
 0x1f8   :  { %v327_v31 = vadd.f32 %v1032_v28, %v326_v29  ;;  %v1104_v32 = vpop.f32.mrb[1].mxu1  ;;  %v1047_v28 = vld [vmem:[%s1651_s23] ss:$0 sm:$0xff] }
 0x1fa   :  { %v337_v34 = vmul.f32 %v1034_v30, %v327_v31 }
 0x1fc   :  { %v345_v36 = vadd.f32 %v1035_v33, %v337_v34 }
 0x1fd   :  { %v422_v37 = vpop.f32.mrb[2].mxu1 }
 0x1fe   :  { %v423_v39 = vadd.f32 %v1036_v35, %v422_v37  ;;  %v1113_v40 = vpop.f32.mrb[3].mxu1  ;;  %1131 = vmatmul.mubr.msk.f32.vlgmr.msra.gmra.mrb[4].mxu1 %vm442_vm3, %v345_v36  ;;  %443 = vst.msk [vmem:[#allocation2] sm:$0xff] %vm442_vm3, %v345_v36 }
 0x1ff   :  { %1137 = vmatprep.mubr.msk.f32.mxu1 %vm1325_vm0, %v1326_v6  ;;  %1164 = vmatpush3.bf16.msra.mxu1 %v1163_v52 }
 0x200   :  { %v433_v42 = vmul.f32 %v1038_v38, %v423_v39 }
 0x202   :  { %v441_v43 = vadd.f32 %v1039_v41, %v433_v42 }
 0x204   :  { %v446_v44 = vmul.f32 0.5, %v441_v43  ;;  %444 = vst.msk [vmem:[#allocation4] sm:$0xff] %vm442_vm3, %v441_v43 }
 0x206   :  { %v447_v45 = vmul.f32 1.442695, %v446_v44 }
 0x208   :  { %1209 = vpow2.f32 %v447_v45 }
 0x212   :  { %v1210_v47 = vpop.eup %1209 }
 0x213   :  { %v449_v48 = vmul.f32 %v1210_v47, %v445_v46 }
 0x215   :  { %v450_v49 = vadd.f32 %v449_v48, %v345_v36  ;;  %v1056_v36 = vld [vmem:[%s1652_s26] ss:$0 sm:$0xff] }
 0x217   :  { %1117 = vmatmul.mubr.msk.f32.vlgmr.msra.gmra.mrb[2].mxu0 %vm442_vm3, %v450_v49 }
 0x218   :  { %1125 = vmatprep.mubr.msk.f32.mxu0 %vm1325_vm0, %v1326_v6  ;;  %1161 = vmatpush3.bf16.msra.mxu0 %v1160_v55 }
 0x219   :  { %1123 = vmatprep.subr.mxu0 %v1326_v6 }
 0x21c   :  { %1124 = vmatpush3.msra.mxu0 %v551_v56 }
 0x21d   :  { %1165 = vmatprep.subr.bf16.mxu0 %v1324_v3  ;;  %v1042_v3 = vld [vmem:[%s1643_s3] ss:$0 sm:$0xff] }
 0x2d1   :  { %v732_v58 = vpop.f32.mrb[4].mxu1 }
 0x2d2   :  { %v733_v60 = vadd.f32 %v1048_v57, %v732_v58  ;;  %v1132_v61 = vpop.f32.mrb[5].mxu1 }
 0x2d4   :  { %v743_v63 = vmul.f32 %v1050_v59, %v733_v60 }
 0x2d6   :  { %v751_v0 = vadd.f32 %v1051_v62, %v743_v63 }
 0x2d8   :  { %v752_v1 = vmax.f32 %v751_v0, 0.0 }
 0x2da   :  { %1138 = vmatmul.mubr.msk.f32.vlgmr.msra.gmra.mrb[6].mxu1 %vm762_vm4, %v752_v1 }
 0x2ea   :  { %v528_v4 = vpop.f32.mrb[2].mxu0 }
 0x2eb   :  { %v529_v5 = vadd.f32 %v1040_v2, %v528_v4  ;;  %v1118_v7 = vpop.f32.mrb[3].mxu0 }
 0x2ed   :  { %v539_v9 = vmul.f32 %v1042_v3, %v529_v5 }
 0x2ef   :  { %v547_v10 = vadd.f32 %v1043_v8, %v539_v9 }
 0x2f1   :  { %v548_v11 = vmax.f32 %v547_v10, 0.0 }
 0x2f3   :  { %1126 = vmatmul.mubr.msk.f32.vlgmr.msra.gmra.mrb[4].mxu0 %vm256_vm2, %v548_v11 }
 0x2f4   :  { %1144 = vmatprep.mubr.msk.f32.mxu0 %vm1325_vm0, %v1326_v6  ;;  %1167 = vmatpush3.bf16.msra.mxu0 %v1166_v14 }
 0x3ad   :  { %v832_v16 = vpop.f32.mrb[6].mxu1 }
 0x3ae   :  { %v833_v18 = vadd.f32 %v1052_v15, %v832_v16  ;;  %v1139_v19 = vpop.f32.mrb[7].mxu1 }
 0x3b0   :  { %v843_v21 = vmul.f32 %v1054_v17, %v833_v18 }
 0x3b2   :  { %v851_v22 = vadd.f32 %v1055_v20, %v843_v21 }
 0x3b4   :  { %v852_v23 = vmax.f32 %v851_v22, 0.0 }
 0x3b6   :  { %1145 = vmatmul.mubr.msk.f32.vlgmr.msra.gmra.mrb[6].mxu0 %vm762_vm4, %v852_v23 }
 0x3c6   :  { %v628_v6 = vpop.f32.mrb[4].mxu0 }
 0x3c7   :  { %v629_v26 = vadd.f32 %v1044_v24, %v628_v6  ;;  %v1127_v27 = vpop.f32.mrb[5].mxu0 }
 0x3c9   :  { %v639_v29 = vmul.f32 %v1046_v25, %v629_v26 }
 0x3cb   :  { %v647_v30 = vadd.f32 %v1047_v28, %v639_v29 }
 0x3cd   :  { %v648_v31 = vsub.f32 0.0, %v647_v30 }
 0x3cf   :  { %v649_v32 = vmul.f32 1.442695, %v648_v31 }
 0x3d1   :  { %1211 = vpow2.f32 %v649_v32 }
 0x3db   :  { %v1212_v33 = vpop.eup %1211 }
 0x3dc   :  { %v651_v34 = vadd.f32 1.0, %v1212_v33 }
 0x3de   :  { %1213 = vrcp.f32 %v651_v34 }
 0x3e8   :  { %v1214_v35 = vpop.eup %1213 }
 0x3e9   :  { %654 = vst.msk [vmem:[#allocation6] sm:$0xff] %vm155_vm1, %v1214_v35 }
 0x489   :  { %v931_v37 = vpop.f32.mrb[6].mxu0 }
 0x48a   :  { %v932_v38 = vadd.f32 %v1056_v36, %v931_v37  ;;  %v1146_v39 = vpop.f32.mrb[7].mxu0 }
 0x48c   :  { %v936_v40 = vsel %vm935_vm5, %v932_v38, -inf }
 0x48d   :  { %937 = vmax.xlane.f32.xlu0 %v936_v40 }
 0x51a   :  { %v938_v41 = vpop.xlane.xlu0 %937 }
 0x51b   :  { %v939_v42 = vsub.f32 %v932_v38, %v938_v41 }
 0x51d   :  { %v940_v43 = vmul.f32 1.442695, %v939_v42 }
 0x51f   :  { %1215 = vpow2.f32 %v940_v43 }
 0x529   :  { %v1216_v44 = vpop.eup %1215 }
 0x52a   :  { %v942_v45 = vsel %vm935_vm5, %v1216_v44, 0.0 }
 0x52b   :  { %943 = vadd.xlane.f32.xlu0 %v942_v45 }
 0x52c   :  { %1230 = shalt.err (!%p1227_p4)
}
 0x52d   :  { %s1231_s11 = scalar_lea.hbm %s1503_s4, 128 }
 0x52e   :  { %p1232_p5 = scmp.ne.s32.totalorder %s1503_s4, %s1231_s11  ;;  %p1235_p6 = scmp.lt.u32.totalorder %s1231_s11, %s1503_s4 }
 0x530   :  { %p1237_p7 = pnand %p1235_p6, %p1232_p5 }
 0x532   :  { %1240 = shalt.err (!%p1237_p7)
}
 0x533   :  { %967 = dma.vmem_to_hbm [thread:$0]  %s965_s1, 128, %s1503_s4, [#allocation5]  }
 0x534   :  { %s1241_s15 = scalar_lea.vmem %s955_s7, 128  ;;  %p1246_p9 = scmp.lt.s32.totalorder %s955_s7, %s955_s7 }
 0x535   :  { %p1242_p8 = scmp.ne.s32.totalorder %s955_s7, %s1241_s15  ;;  %p1247_p10 = scmp.lt.s32.totalorder %s1241_s15, %s1241_s15 }
 0x537   :  { %p1248_p11 = por %p1247_p10, %p1246_p9 }
 0x539   :  { %p1249_p12 = pnand %p1248_p11, %p1242_p8 }
 0x53b   :  { %1252 = shalt.err (!%p1249_p12)
}
 0x53c   :  { %s1253_s16 = scalar_lea.hbm %s1498_s27, 128 }
 0x53d   :  { %p1254_p13 = scmp.ne.s32.totalorder %s1498_s27, %s1253_s16  ;;  %p1257_p0 = scmp.lt.u32.totalorder %s1253_s16, %s1498_s27 }
 0x53f   :  { %p1259_p1 = pnand %p1257_p0, %p1254_p13 }
 0x541   :  { %1262 = shalt.err (!%p1259_p1)
}
 0x542   :  { %957 = dma.vmem_to_hbm [thread:$0]  %s955_s7, 128, %s1498_s27, [#allocation3]  }
 0x543   :  { %s1329_s18 = smov [#allocation6]  }
 0x544   :  { %s974_s4 = sshll.u32 %s1329_s18, 4  ;;  %s975_s4 = int_to_ptr.vmem [resolvable:$true] %s974_s4 }
 0x545   :  { %s1263_s0 = scalar_lea.vmem %s975_s4, 128  ;;  %p1268_p3 = scmp.lt.s32.totalorder %s975_s4, %s975_s4 }
 0x546   :  { %p1264_p2 = scmp.ne.s32.totalorder %s975_s4, %s1263_s0  ;;  %p1269_p4 = scmp.lt.s32.totalorder %s1263_s0, %s1263_s0 }
 0x548   :  { %p1270_p5 = por %p1269_p4, %p1268_p3 }
 0x54a   :  { %p1271_p6 = pnand %p1270_p5, %p1264_p2 }
 0x54c   :  { %1274 = shalt.err (!%p1271_p6)
}
 0x54d   :  { %s1275_s5 = scalar_lea.hbm %s1508_s6, 128 }
 0x54e   :  { %p1276_p7 = scmp.ne.s32.totalorder %s1508_s6, %s1275_s5  ;;  %p1279_p8 = scmp.lt.u32.totalorder %s1275_s5, %s1508_s6 }
 0x550   :  { %p1281_p9 = pnand %p1279_p8, %p1276_p7 }
 0x552   :  { %1284 = shalt.err (!%p1281_p9)
}
 0x553   :  { %977 = dma.vmem_to_hbm [thread:$0]  %s975_s4, 128, %s1508_s6, [#allocation5]  }
 0x5b8   :  { %v944_v46 = vpop.xlane.xlu0 %943 }
 0x5b9   :  { %1217 = vrcp.f32 %v944_v46 }
 0x5c3   :  { %v1218_v47 = vpop.eup %1217 }
 0x5c4   :  { %v946_v48 = vmul.f32 %v1218_v47, %v1216_v44 }
 0x5c6   :  { %947 = vst.msk [vmem:[%s1513_s20] sm:$0xff] %vm935_vm5, %v946_v48 }
 0x5c7   :  { %1285 = dma.done.wait [#allocation3], 128  }
 0x5c8   :  { %1286 = vsyncadd [#allocation3], 4294967168 }
 0x5c9   :  { %1287 = dma.done.wait [#allocation5], 256  }
 0x5ca   :  { %1288 = vsyncadd [#allocation5], 4294967040 }
 0x5cb   :  { %991 = vsyncpa [#allocation3], 1 }
 0x5cc   :  { %992 = vsyncpa [#allocation5], 1 }

</bundles_post_ra>
